<compile_context>
chip_gen: v7x
topology: tpu7x:2x2x1
jax: 0.10.0
libtpu: 0.0.40
codegen_flags: <defaults>
</compile_context>

<pallas_src>
import functools

import jax
import jax.numpy as jnp
from jax.experimental import pallas as pl
from jax.experimental.pallas import tpu as pltpu

_MAX_ROW_TILE = 8192   # VMEM budget is the real cap; this only bounds pathological cases.
_LANE = 128


def _vmem_plan():
    """Returns (vmem_limit_bytes, target_tile_bytes, working_set_budget_bytes)."""
    cap = None
    try:
        cap = int(pltpu.get_tpu_info().vmem_capacity_bytes)
    except Exception:
        cap = None
    if cap is not None and cap >= 96 * 1024 * 1024:
        # v5e / v6e class: 128 MiB physical VMEM; tile-size curve plateaus ~4 MiB.
        limit, target = 64 * 1024 * 1024, 4 * 1024 * 1024
    else:
        # v7x class (64 MiB physical, 3.2 TB/s HBM) or unknown: bigger tiles, tighter limit.
        limit, target = 48 * 1024 * 1024, 8 * 1024 * 1024
        if cap is not None:
            limit = min(limit, max(cap - 16 * 1024 * 1024, 16 * 1024 * 1024))
    budget = max(limit - 12 * 1024 * 1024, 8 * 1024 * 1024)
    return limit, target, budget


def _choose_row_tile(rows, features, itemsize, target_bytes, budget_bytes, f32_rows_live):
    """Row tile: big enough to amortize per-step overhead, small enough for scoped VMEM."""
    in_row = features * itemsize          # one input/output row in its HBM dtype
    f32_row = features * 4                # one in-kernel f32 working row
    # Double-buffered input + double-buffered output + live f32 intermediates.
    vmem_per_row = 2 * in_row + 2 * in_row + f32_rows_live * f32_row

    tile = max(target_bytes // max(in_row, 1), 8)
    tile = min(tile, max(budget_bytes // max(vmem_per_row, 1), 8), _MAX_ROW_TILE)
    tile = max((tile // 8) * 8, 8)        # sublane multiple

    if rows < 8:
        return rows                       # block dim == full array dim (allowed)
    if rows >= 16:
        # >= 2 grid steps so the "parallel" axis can shard across v7x's 2 TensorCores.
        tile = min(tile, max(((rows // 2) // 8) * 8, 8))
    return min(tile, (rows // 8) * 8)


def _layernorm_kernel(x_ref, a_ref, b_ref, o_ref, *, eps, inv_nm1):
    # x_ref: (tm, F) tile; a_ref/b_ref: (1, F) f32 params broadcast over rows.
    mean = jnp.mean(x_ref[...].astype(jnp.float32), axis=-1, keepdims=True)
    d = x_ref[...].astype(jnp.float32) - mean     # re-read: one (tm, F) f32 stays live
    # torch.std default is unbiased (divide by N-1); the module adds eps to std, not var.
    var = jnp.sum(d * d, axis=-1, keepdims=True) * jnp.float32(inv_nm1)
    inv = pl.reciprocal(jnp.sqrt(var) + jnp.float32(eps), approx=False)
    o_ref[...] = ((d * inv) * a_ref[...] + b_ref[...]).astype(o_ref.dtype)


def _layernorm_folded_kernel(x_ref, a_ref, b_ref, s_ref, st_ref, o_ref, *,
                             eps, inv_nm1, inv_f):
    # x_ref: (tm, k*F) with k original rows folded into lanes (lane-dense).
    # s_ref: (k*F, k) 0/1 segment-selector, st_ref: (k, k*F) its transpose.
    # Per-segment reductions/broadcasts go through the MXU so everything stays lane-dense.
    x = x_ref[...].astype(jnp.float32)
    s = s_ref[...]
    s_t = st_ref[...]
    seg_sum = jnp.dot(x, s, preferred_element_type=jnp.float32)            # (tm, k)
    mean_seg = seg_sum * jnp.float32(inv_f)
    mean_b = jnp.dot(mean_seg, s_t, preferred_element_type=jnp.float32)    # (tm, k*F)
    d = x - mean_b
    var = jnp.dot(d * d, s, preferred_element_type=jnp.float32) * jnp.float32(inv_nm1)
    inv = pl.reciprocal(jnp.sqrt(var) + jnp.float32(eps), approx=False)    # (tm, k)
    inv_b = jnp.dot(inv, s_t, preferred_element_type=jnp.float32)          # (tm, k*F)
    o_ref[...] = ((d * inv_b) * a_ref[...] + b_ref[...]).astype(o_ref.dtype)


def layer_norm(x, a_2, b_2, eps=1e-6, row_tile=None):
    """x: (..., F) array. a_2, b_2: (F,) params. Matches the PyTorch module's forward."""
    orig_shape = x.shape
    features = orig_shape[-1]
    x2 = x.reshape(-1, features)
    rows = x2.shape[0]

    # torch.std over a single element is 0/0 = NaN; preserve that instead of crashing.
    inv_nm1 = 1.0 / (features - 1) if features > 1 else float("nan")

    limit, target_bytes, budget_bytes = _vmem_plan()
    a32 = a_2.astype(jnp.float32)
    b32 = b_2.astype(jnp.float32)

    fold = (features < _LANE and _LANE % features == 0
            and rows % (_LANE // features) == 0 and rows >= (_LANE // features))
    # TODO(synk): ragged F (F % 128 != 0 with F > 128) and rows not divisible by k still
    # take the lane-sparse path; padding F / rows would make those lane-dense too.

    if fold:
        k = _LANE // features
        kf = k * features
        rows_f = rows // k
        x_fold = x2.reshape(rows_f, kf)
        a_fold = jnp.tile(a32, k).reshape(1, kf)
        b_fold = jnp.tile(b32, k).reshape(1, kf)
        seg = jnp.arange(kf, dtype=jnp.int32) // features
        s = (seg[:, None] == jnp.arange(k, dtype=jnp.int32)[None, :]).astype(jnp.float32)
        s_t = jnp.transpose(s)

        if row_tile is None:
            row_tile = _choose_row_tile(rows_f, kf, x2.dtype.itemsize,
                                        target_bytes, budget_bytes, f32_rows_live=4)
        kernel = functools.partial(_layernorm_folded_kernel, eps=eps,
                                   inv_nm1=inv_nm1, inv_f=1.0 / features)
        out = pl.pallas_call(
            kernel,
            out_shape=jax.ShapeDtypeStruct((rows_f, kf), x.dtype),
            grid_spec=pltpu.PrefetchScalarGridSpec(
                num_scalar_prefetch=0,
                grid=(pl.cdiv(rows_f, row_tile),),
                in_specs=[
                    pl.BlockSpec((row_tile, kf), lambda i: (i, 0)),
                    pl.BlockSpec((1, kf), lambda i: (0, 0)),
                    pl.BlockSpec((1, kf), lambda i: (0, 0)),
                    pl.BlockSpec((kf, k), lambda i: (0, 0)),
                    pl.BlockSpec((k, kf), lambda i: (0, 0)),
                ],
                out_specs=pl.BlockSpec((row_tile, kf), lambda i: (i, 0)),
            ),
            compiler_params=pltpu.CompilerParams(
                dimension_semantics=("parallel",),
                vmem_limit_bytes=limit,
            ),
        )(x_fold, a_fold, b_fold, s, s_t)
        return out.reshape(orig_shape)

    if row_tile is None:
        row_tile = _choose_row_tile(rows, features, x2.dtype.itemsize,
                                    target_bytes, budget_bytes, f32_rows_live=2)
    kernel = functools.partial(_layernorm_kernel, eps=eps, inv_nm1=inv_nm1)
    out = pl.pallas_call(
        kernel,
        out_shape=jax.ShapeDtypeStruct((rows, features), x.dtype),
        grid_spec=pltpu.PrefetchScalarGridSpec(
            num_scalar_prefetch=0,
            grid=(pl.cdiv(rows, row_tile),),
            in_specs=[
                pl.BlockSpec((row_tile, features), lambda i: (i, 0)),
                pl.BlockSpec((1, features), lambda i: (0, 0)),
                pl.BlockSpec((1, features), lambda i: (0, 0)),
            ],
            out_specs=pl.BlockSpec((row_tile, features), lambda i: (i, 0)),
        ),
        compiler_params=pltpu.CompilerParams(
            dimension_semantics=("parallel",),
            vmem_limit_bytes=limit,
        ),
    )(x2, a32.reshape(1, features), b32.reshape(1, features))
    return out.reshape(orig_shape)


if __name__ == "__main__":
    key = jax.random.PRNGKey(0)
    eps = 1e-6

    def ref_ln(x, a, b):
        mean = jnp.mean(x, axis=-1, keepdims=True)
        n = x.shape[-1]
        std = jnp.sqrt(jnp.sum((x - mean) ** 2, axis=-1, keepdims=True) / (n - 1))
        return a * (x - mean) / (std + eps) + b

    # Primary: F=32 (lane-folded path), shapes consistent with the module's forward.
    B, S, F = 2, 8, 32
    x = jax.random.normal(key, (B, S, F), dtype=jnp.float32)
    a_2 = jnp.ones((F,), dtype=jnp.float32)    # nn.Parameter(torch.ones(features))
    b_2 = jnp.zeros((F,), dtype=jnp.float32)   # nn.Parameter(torch.zeros(features))
    y = jax.block_until_ready(layer_norm(x, a_2, b_2, eps=eps))
    assert y.shape == x.shape and y.dtype == x.dtype
    assert jnp.allclose(y, ref_ln(x, a_2, b_2), atol=1e-5, rtol=1e-5)

    # Secondary: F=128 (plain lane-dense path, multi-step grid / megacore cap).
    F2 = 128
    x2 = jax.random.normal(jax.random.PRNGKey(1), (B, S, F2), dtype=jnp.float32)
    a2 = jnp.linspace(0.5, 1.5, F2, dtype=jnp.float32)
    b2 = jnp.linspace(-0.25, 0.25, F2, dtype=jnp.float32)
    y2 = jax.block_until_ready(layer_norm(x2, a2, b2, eps=eps))
    assert jnp.allclose(y2, ref_ln(x2, a2, b2), atol=1e-5, rtol=1e-5)

    print("KERNEL_OK")
</pallas_src>

<mosaic_0001>
module attributes {stable_mosaic.version = 11 : i64} {
  func.func @_layernorm_folded_kernel(%arg0: i32, %arg1: memref<4x128xf32, #tpu.memory_space<vmem>>, %arg2: memref<1x128xf32, #tpu.memory_space<vmem>>, %arg3: memref<1x128xf32, #tpu.memory_space<vmem>>, %arg4: memref<128x4xf32, #tpu.memory_space<vmem>>, %arg5: memref<4x128xf32, #tpu.memory_space<vmem>>, %arg6: memref<4x128xf32, #tpu.memory_space<vmem>>) attributes {dimension_semantics = [#tpu.dimension_semantics<parallel>], iteration_bounds = array<i64: 1>, scalar_prefetch = 0 : i64, scratch_operands = 0 : i64, tpu.core_type = #tpu.core_type<tc>, window_params = [{transform_indices = @transform_0, window_bounds = array<i64: 4, 128>}, {pipeline_mode = #tpu.pipeline_mode<synchronous>, transform_indices = @transform_1, window_bounds = array<i64: 1, 128>}, {pipeline_mode = #tpu.pipeline_mode<synchronous>, transform_indices = @transform_2, window_bounds = array<i64: 1, 128>}, {pipeline_mode = #tpu.pipeline_mode<synchronous>, transform_indices = @transform_3, window_bounds = array<i64: 128, 4>}, {pipeline_mode = #tpu.pipeline_mode<synchronous>, transform_indices = @transform_4, window_bounds = array<i64: 4, 128>}, {transform_indices = @transform_5, window_bounds = array<i64: 4, 128>}]} {
    %c0 = arith.constant 0 : index
    %c0_0 = arith.constant 0 : index
    %0 = vector.load %arg1[%c0, %c0_0] : memref<4x128xf32, #tpu.memory_space<vmem>>, vector<4x128xf32>
    %c0_1 = arith.constant 0 : index
    %c0_2 = arith.constant 0 : index
    %1 = vector.load %arg4[%c0_1, %c0_2] : memref<128x4xf32, #tpu.memory_space<vmem>>, vector<128x4xf32>
    %c0_3 = arith.constant 0 : index
    %c0_4 = arith.constant 0 : index
    %2 = vector.load %arg5[%c0_3, %c0_4] : memref<4x128xf32, #tpu.memory_space<vmem>>, vector<4x128xf32>
    %cst = arith.constant dense<0.000000e+00> : vector<4x4xf32>
    %3 = tpu.matmul %0, %1, %cst {dimension_numbers = #tpu.dot_dimension_numbers<[1], [0], [0], [1], [0, 0, 1, 1], [], []>} : vector<4x128xf32>, vector<128x4xf32>, vector<4x4xf32> -> vector<4x4xf32>
    %cst_5 = arith.constant 3.125000e-02 : f32
    %4 = vector.broadcast %cst_5 : f32 to vector<4x4xf32>
    %5 = arith.mulf %3, %4 : vector<4x4xf32>
    %cst_6 = arith.constant dense<0.000000e+00> : vector<4x128xf32>
    %6 = tpu.matmul %5, %2, %cst_6 {dimension_numbers = #tpu.dot_dimension_numbers<[1], [0], [0], [1], [0, 0, 1, 1], [], []>} : vector<4x4xf32>, vector<4x128xf32>, vector<4x128xf32> -> vector<4x128xf32>
    %7 = arith.subf %0, %6 : vector<4x128xf32>
    %8 = arith.mulf %7, %7 : vector<4x128xf32>
    %cst_7 = arith.constant dense<0.000000e+00> : vector<4x4xf32>
    %9 = tpu.matmul %8, %1, %cst_7 {dimension_numbers = #tpu.dot_dimension_numbers<[1], [0], [0], [1], [0, 0, 1, 1], [], []>} : vector<4x128xf32>, vector<128x4xf32>, vector<4x4xf32> -> vector<4x4xf32>
    %cst_8 = arith.constant 0.0322580636 : f32
    %10 = vector.broadcast %cst_8 : f32 to vector<4x4xf32>
    %11 = arith.mulf %9, %10 : vector<4x4xf32>
    %12 = math.sqrt %11 : vector<4x4xf32>
    %cst_9 = arith.constant 9.99999997E-7 : f32
    %13 = vector.broadcast %cst_9 : f32 to vector<4x4xf32>
    %14 = arith.addf %12, %13 : vector<4x4xf32>
    %15 = tpu.reciprocal %14 : vector<4x4xf32> -> vector<4x4xf32>
    %cst_10 = arith.constant dense<0.000000e+00> : vector<4x128xf32>
    %16 = tpu.matmul %15, %2, %cst_10 {dimension_numbers = #tpu.dot_dimension_numbers<[1], [0], [0], [1], [0, 0, 1, 1], [], []>} : vector<4x4xf32>, vector<4x128xf32>, vector<4x128xf32> -> vector<4x128xf32>
    %17 = arith.mulf %7, %16 : vector<4x128xf32>
    %c0_11 = arith.constant 0 : index
    %c0_12 = arith.constant 0 : index
    %18 = vector.load %arg2[%c0_11, %c0_12] : memref<1x128xf32, #tpu.memory_space<vmem>>, vector<1x128xf32>
    %19 = vector.broadcast %18 : vector<1x128xf32> to vector<4x128xf32>
    %20 = arith.mulf %17, %19 : vector<4x128xf32>
    %c0_13 = arith.constant 0 : index
    %c0_14 = arith.constant 0 : index
    %21 = vector.load %arg3[%c0_13, %c0_14] : memref<1x128xf32, #tpu.memory_space<vmem>>, vector<1x128xf32>
    %22 = vector.broadcast %21 : vector<1x128xf32> to vector<4x128xf32>
    %23 = arith.addf %20, %22 : vector<4x128xf32>
    %c0_15 = arith.constant 0 : index
    %c0_16 = arith.constant 0 : index
    %24 = vector.load %arg6[%c0_15, %c0_16] : memref<4x128xf32, #tpu.memory_space<vmem>>, vector<4x128xf32>
    tpu.vector_store %arg6[%c0_15, %c0_16], %23 {strides = array<i32>} : memref<4x128xf32, #tpu.memory_space<vmem>>, vector<4x128xf32>,
    return
  }
  func.func @transform_0(%arg0: i32) -> (i32, i32) {
    %c0_i32 = arith.constant 0 : i32
    %c0_i32_0 = arith.constant 0 : i32
    return %arg0, %c0_i32 : i32, i32
  }
  func.func @transform_1(%arg0: i32) -> (i32, i32) {
    %c0_i32 = arith.constant 0 : i32
    %c0_i32_0 = arith.constant 0 : i32
    %c0_i32_1 = arith.constant 0 : i32
    return %c0_i32, %c0_i32_0 : i32, i32
  }
  func.func @transform_2(%arg0: i32) -> (i32, i32) {
    %c0_i32 = arith.constant 0 : i32
    %c0_i32_0 = arith.constant 0 : i32
    %c0_i32_1 = arith.constant 0 : i32
    return %c0_i32, %c0_i32_0 : i32, i32
  }
  func.func @transform_3(%arg0: i32) -> (i32, i32) {
    %c0_i32 = arith.constant 0 : i32
    %c0_i32_0 = arith.constant 0 : i32
    %c0_i32_1 = arith.constant 0 : i32
    return %c0_i32, %c0_i32_0 : i32, i32
  }
  func.func @transform_4(%arg0: i32) -> (i32, i32) {
    %c0_i32 = arith.constant 0 : i32
    %c0_i32_0 = arith.constant 0 : i32
    %c0_i32_1 = arith.constant 0 : i32
    return %c0_i32, %c0_i32_0 : i32, i32
  }
  func.func @transform_5(%arg0: i32) -> (i32, i32) {
    %c0_i32 = arith.constant 0 : i32
    %c0_i32_0 = arith.constant 0 : i32
    return %arg0, %c0_i32 : i32, i32
  }
}

</mosaic_0001>

<bundles_post_ra>
// kernel: tpu_custom_call.1
= control target key start
LH: loop header
LB: loop body
LE: loop exit
PB: predicated region body
PF: predicated region fallthrough
CT: control target
= control target key end

     0   :  { %v579_v3 = vmov 0.0|0.0   ;;  %vm580_vm0 = vmmov 0   ;;  %v581_v6 = vmov 0.0   ;;  %s707_s0 = inlined_call_operand.vmem [shape: f32[4,128], index: 0, kind: input, shape index: {}]   ;;  %s708_s1 = inlined_call_operand.vmem [shape: f32[1,128], index: 1, kind: input, shape index: {}]   ;;  %s709_s2 = inlined_call_operand.vmem [shape: f32[1,128], index: 2, kind: input, shape index: {}]   ;;  %s710_s3 = inlined_call_operand.vmem [shape: f32[128,4], index: 3, kind: input, shape index: {}]   ;;  %s711_s4 = inlined_call_operand.vmem [shape: f32[4,128], index: 4, kind: input, shape index: {}]   ;;  %s712_s5 = inlined_call_operand.hbm [shape: f32[4,128], index: 5, kind: output, shape index: {}]  }
   0x1   :  { %v22_v0 = vld [vmem:[%s710_s3] sm:$0xff]  ;;  %v23_v1 = vld [vmem:[%s710_s3 + $0x8] sm:$0xff]  ;;  %v24_v2 = vld [vmem:[%s710_s3 + $0x10] sm:$0xff]  ;;  %499 = vmatprep.subr.bf16.mxu0 %v579_v3  ;;  %451 = vmatprep.mubr.msk.f32.mxu0 %vm580_vm0, %v581_v6 }
   0x2   :  { %v500_v4 = vpack.c.bf16 %v23_v1, %v22_v0  ;;  %v25_v5 = vld [vmem:[%s710_s3 + $0x18] sm:$0xff]  ;;  %454 = vmatprep.subr.mxu1 %v581_v6  ;;  %456 = vmatprep.mubr.msk.f32.mxu1 %vm580_vm0, %v581_v6  ;;  %v26_v8 = vld [vmem:[%s710_s3 + $0x20] sm:$0xff]  ;;  %v27_v9 = vld [vmem:[%s710_s3 + $0x28] sm:$0xff] }
   0x3   :  { %v503_v7 = vpack.c.bf16 %v25_v5, %v24_v2 }
   0x4   :  { %501 = vmatpush3.bf16.msra.mxu0 %v500_v4 }
   0x5   :  { %502 = vmatprep.subr.bf16.mxu0 %v579_v3 }
   0x6   :  { %10 = vsyncpa [#allocation3], 0  ;;  %v506_v10 = vpack.c.bf16 %v27_v9, %v26_v8  ;;  %v28_v11 = vld [vmem:[%s710_s3 + $0x30] sm:$0xff]  ;;  %v29_v12 = vld [vmem:[%s710_s3 + $0x38] sm:$0xff]  ;;  %vm114_vm1 = vcmask 1043456   ;;  %vm110_vm2 = vcmask 31744  }
   0x7   :  { %v509_v13 = vpack.c.bf16 %v29_v12, %v28_v11  ;;  %v30_v14 = vld [vmem:[%s710_s3 + $0x40] sm:$0xff]  ;;  %v31_v15 = vld [vmem:[%s710_s3 + $0x48] sm:$0xff]  ;;  %v32_v17 = vld [vmem:[%s710_s3 + $0x50] sm:$0xff]  ;;  %s582_s30 = smov [#allocation2]  }
   0x8   :  { %504 = vmatpush3.bf16.msra.mxu0 %v503_v7  ;;  %v512_v16 = vpack.c.bf16 %v31_v15, %v30_v14  ;;  %v33_v18 = vld [vmem:[%s710_s3 + $0x58] sm:$0xff]  ;;  %v34_v20 = vld [vmem:[%s710_s3 + $0x60] sm:$0xff]  ;;  %v35_v21 = vld [vmem:[%s710_s3 + $0x68] sm:$0xff]  ;;  %s367_s6 = sshll.u32 %s582_s30, 4  ;;  %s368_s6 = int_to_ptr.vmem [resolvable:$true] %s367_s6 }
   0x9   :  { %505 = vmatprep.subr.bf16.mxu0 %v579_v3  ;;  %v515_v19 = vpack.c.bf16 %v33_v18, %v32_v17  ;;  %v518_v22 = vpack.c.bf16 %v35_v21, %v34_v20  ;;  %v36_v23 = vld [vmem:[%s710_s3 + $0x70] sm:$0xff]  ;;  %v37_v24 = vld [vmem:[%s710_s3 + $0x78] sm:$0xff]  ;;  %v21_v26 = vld [vmem:[%s707_s0] sm:$0xf]  ;;  %s555_s7 = scalar_lea.vmem %s368_s6, 64  ;;  %p560_p1 = scmp.lt.s32.totalorder %s368_s6, %s368_s6 }
   0xa   :  { %v521_v25 = vpack.c.bf16 %v37_v24, %v36_v23  ;;  %v38_v27 = vld [vmem:[%s711_s4] sm:$0xf]  ;;  %p556_p0 = scmp.ne.s32.totalorder %s368_s6, %s555_s7  ;;  %p561_p2 = scmp.lt.s32.totalorder %s555_s7, %s555_s7 }
   0xb   :  { %455 = vmatpush3.msk.msra.mxu1 %vm114_vm1, %v38_v27  ;;  %v379_v46 = vld [vmem:[%s708_s1] ss:$0 sm:$0xff] }
   0xc   :  { %507 = vmatpush3.bf16.msra.mxu0 %v506_v10  ;;  %523 = vmatprep.subr.bf16.mxu1 %v579_v3  ;;  %v380_v49 = vld [vmem:[%s709_s2] ss:$0 sm:$0xff]  ;;  %p562_p3 = por %p561_p2, %p560_p1 }
   0xd   :  { %508 = vmatprep.subr.bf16.mxu0 %v579_v3 }
   0xe   :  { %p563_p4 = pnand %p562_p3, %p556_p0 }
  0x10   :  { %510 = vmatpush3.bf16.msra.mxu0 %v509_v13 }
  0x11   :  { %511 = vmatprep.subr.bf16.mxu0 %v579_v3 }
  0x14   :  { %513 = vmatpush3.bf16.msra.mxu0 %v512_v16 }
  0x15   :  { %514 = vmatprep.subr.bf16.mxu0 %v579_v3 }
  0x18   :  { %516 = vmatpush3.bf16.msra.mxu0 %v515_v19 }
  0x19   :  { %517 = vmatprep.subr.bf16.mxu0 %v579_v3 }
  0x1c   :  { %519 = vmatpush3.bf16.msra.mxu0 %v518_v22 }
  0x1d   :  { %520 = vmatprep.subr.bf16.mxu0 %v579_v3 }
  0x20   :  { %522 = vmatpush3.bf16.msra.mxu0 %v521_v25 }
  0x21   :  { %494 = vmatprep.subr.mxu0 %v581_v6 }
  0x23   :  { %452 = vmatmul.mubr.f32.vlgmr.msra.gmra.mrb[0].mxu0 %v21_v26 }
  0x24   :  { %496 = vmatprep.mubr.msk.f32.mxu0 %vm580_vm0, %v581_v6  ;;  %495 = vmatpush3.msk.msra.mxu0 %vm114_vm1, %v38_v27 }
  0xf6   :  { %v105_v28 = vpop.f32.mrb[0].mxu0 }
  0xf7   :  { %v109_v29 = vmul.f32 0.03125, %v105_v28  ;;  %v453_v30 = vpop.f32.mrb[1].mxu0 }
  0xf9   :  { %457 = vmatmul.mubr.msk.f32.vlgmr.msra.gmra.mrb[0].mxu1 %vm110_vm2, %v109_v29 }
  0xfa   :  { %525 = vmatpush3.bf16.msra.mxu1 %v500_v4  ;;  %491 = vmatprep.mubr.msk.f32.mxu1 %vm580_vm0, %v581_v6 }
  0xfb   :  { %526 = vmatprep.subr.bf16.mxu1 %v579_v3 }
  0xfe   :  { %528 = vmatpush3.bf16.msra.mxu1 %v503_v7 }
  0xff   :  { %529 = vmatprep.subr.bf16.mxu1 %v579_v3 }
 0x102   :  { %531 = vmatpush3.bf16.msra.mxu1 %v506_v10 }
 0x103   :  { %532 = vmatprep.subr.bf16.mxu1 %v579_v3 }
 0x106   :  { %534 = vmatpush3.bf16.msra.mxu1 %v509_v13 }
 0x107   :  { %535 = vmatprep.subr.bf16.mxu1 %v579_v3 }
 0x10a   :  { %537 = vmatpush3.bf16.msra.mxu1 %v512_v16 }
 0x10b   :  { %538 = vmatprep.subr.bf16.mxu1 %v579_v3 }
 0x10e   :  { %540 = vmatpush3.bf16.msra.mxu1 %v515_v19 }
 0x10f   :  { %541 = vmatprep.subr.bf16.mxu1 %v579_v3 }
 0x112   :  { %543 = vmatpush3.bf16.msra.mxu1 %v518_v22 }
 0x113   :  { %544 = vmatprep.subr.bf16.mxu1 %v579_v3 }
 0x116   :  { %546 = vmatpush3.bf16.msra.mxu1 %v521_v25 }
 0x1cc   :  { %v184_v31 = vpop.f32.mrb[0].mxu1 }
 0x1cd   :  { %v188_v32 = vsub.f32 %v21_v26, %v184_v31  ;;  %v458_v33 = vpop.f32.mrb[1].mxu1 }
 0x1cf   :  { %v189_v34 = vmul.f32 %v188_v32, %v188_v32 }
 0x1d1   :  { %492 = vmatmul.mubr.f32.vlgmr.msra.gmra.mrb[2].mxu1 %v189_v34 }
 0x2a4   :  { %v256_v35 = vpop.f32.mrb[2].mxu1 }
 0x2a5   :  { %v260_v36 = vmul.f32 0.032258064, %v256_v35  ;;  %v493_v37 = vpop.f32.mrb[3].mxu1 }
 0x2a7   :  { %551 = vrsqrt.f32 %v260_v36  ;;  %vm263_vm3 = vcmp.eq.f32.partialorder %v260_v36, inf  ;;  %v266_v40 = vand.u32 2147483648, %v260_v36  ;;  %vm265_vm4 = vcmp.eq.f32.partialorder %v260_v36, 0.0 }
 0x2b1   :  { %v552_v38 = vpop.eup %551 }
 0x2b2   :  { %v262_v39 = vmul.f32 %v552_v38, %v260_v36 }
 0x2b4   :  { %v264_v41 = vsel %vm263_vm3, %v260_v36, %v262_v39 }
 0x2b5   :  { %v267_v42 = vsel %vm265_vm4, %v266_v40, %v264_v41 }
 0x2b6   :  { %v268_v43 = vadd.f32 1e-06, %v267_v42 }
 0x2b8   :  { %553 = vrcp.f32 %v268_v43 }
 0x2c2   :  { %v554_v44 = vpop.eup %553 }
 0x2c3   :  { %497 = vmatmul.mubr.msk.f32.vlgmr.msra.gmra.mrb[2].mxu0 %vm110_vm2, %v554_v44 }
 0x396   :  { %v339_v45 = vpop.f32.mrb[2].mxu0 }
 0x397   :  { %v343_v47 = vmul.f32 %v339_v45, %v188_v32  ;;  %v498_v48 = vpop.f32.mrb[3].mxu0 }
 0x399   :  { %v351_v50 = vmul.f32 %v379_v46, %v343_v47 }
 0x39b   :  { %v359_v51 = vadd.f32 %v380_v49, %v351_v50 }
 0x39d   :  { %360 = vst [vmem:[#allocation2] sm:$0xf] %v359_v51 }
 0x39e   :  { %566 = shalt.err (!%p563_p4)
}
 0x39f   :  { %s567_s9 = scalar_lea.hbm %s712_s5, 64 }
 0x3a0   :  { %p568_p5 = scmp.ne.s32.totalorder %s712_s5, %s567_s9  ;;  %p571_p6 = scmp.lt.u32.totalorder %s567_s9, %s712_s5 }
 0x3a2   :  { %p573_p7 = pnand %p571_p6, %p568_p5 }
 0x3a4   :  { %576 = shalt.err (!%p573_p7)
}
 0x3a5   :  { %370 = dma.vmem_to_hbm [thread:$0]  %s368_s6, 64, %s712_s5, [#allocation3]  }
 0x3a6   :  { %577 = dma.done.wait [#allocation3], 64  }
 0x3a7   :  { %578 = vsyncadd [#allocation3], 4294967232 }
 0x3a8   :  { %374 = vsyncpa [#allocation3], 1 }

</bundles_post_ra>
